<compile_context>
chip_gen: v7x
topology: tpu7x:2x2x1
jax: 0.10.0
libtpu: 0.0.40
codegen_flags: <defaults>
</compile_context>

<pallas_src>
import jax
import jax.numpy as jnp
from jax.experimental import pallas as pl
from jax.experimental.pallas import tpu as pltpu


def _ru(x, m):
    return -(-int(x) // m) * m


def _padded_bytes(shape, itemsize):
    """Bytes of a VMEM buffer after (8, 128) sublane/lane padding."""
    lead = 1
    for d in shape[:-2]:
        lead *= int(d)
    return lead * _ru(shape[-2], 8) * _ru(shape[-1], 128) * itemsize


def _pick_tile_r(r_total, p, c_in, itemsize, budget_bytes=4 << 20, cap=1024):
    """Pick the final-output-pixel tile (lane width of the output block)."""
    if r_total % 128 != 0:
        # TODO(synk): small / non-128-divisible R falls back to a single tile;
        # fine for the test shape, revisit for huge images with odd batch.
        return r_total
    row_bytes = _ru(4 * c_in, 8) * itemsize
    max_mt = max(128, budget_bytes // max(row_bytes, 1))
    tile = 128
    while (tile * 2 <= cap and r_total % (tile * 2) == 0
           and p * tile * 2 <= max_mt):
        tile *= 2
    return tile


def _prepare_input(x, num_layers, tile_r):
    """NCHW -> (4*C_in, M_total) nested-parity / tap-major layout.

    Row index  K = (kh1, kw1, c)   -- layer-1's 2x2 tap folded into K so the
    first conv is a single GEMM.
    Column (lane) digits, MSB -> LSB:
        [ r_tile | (kh2,kw2) (kh3,kw3) ... (khL,kwL) | r_local ]
    where (r_tile, r_local) split R = (batch, h_out, w_out) (row-major) into
    tiles of tile_r and (khl, kwl) is the 2x2 parity consumed by layer l.
    With this order, every later layer's 2x2 patch gather is a contiguous
    lane slice of the previous layer's output, and the final layer's columns
    enumerate the output pixels directly.
    """
    n, c, h, w = x.shape
    L = num_layers
    h_out, w_out = h >> L, w >> L
    xr = x.reshape((n, c, h_out) + (2,) * L + (w_out,) + (2,) * L)
    # xr axes: 0 n | 1 c | 2 h_out | 3..2+L  h-bits a_L..a_1 (a_k = bit k-1 of h)
    #          3+L w_out | 4+L..3+2L w-bits b_L..b_1
    ax_a = lambda k: 3 + (L - k)
    ax_b = lambda k: 4 + 2 * L - k
    perm = [ax_a(1), ax_b(1), 1]                      # K = (kh1, kw1, c)
    for k in range(2, L + 1):                         # parities eaten by layer k
        perm += [ax_a(k), ax_b(k)]
    perm += [0, 2, 3 + L]                             # R = (n, h_out, w_out)
    p = 4 ** (L - 1)
    r_total = n * h_out * w_out
    a = jnp.transpose(xr, perm).reshape(4 * c, p, r_total)
    # Regroup so each R-tile owns a contiguous [parities | r_local] lane span.
    # TODO(synk): this host-side rearrangement is one extra HBM read+write of
    # the input; it could be removed via in-kernel strided tap extraction or
    # XLA input fusion.  Kept host-side for simplicity/robustness.
    a = a.reshape(4 * c, p, r_total // tile_r, tile_r)
    a = jnp.transpose(a, (0, 2, 1, 3))
    return a.reshape(4 * c, (r_total // tile_r) * p * tile_r)


def _fused_downsample_kernel(x_ref, *refs):
    """refs = (w_0, b_0, w_1, b_1, ..., out_ref).

    x_ref : (4*C_in, M_t)          layer-1 patches, tap folded into rows
    w_0   : (C_out0, 4*C_in)       layer-1 weight  (single GEMM)
    w_l   : (4, C_out_l, C_in_l)   per-tap matrices, tap = kh*2 + kw  (l >= 2)
    b_l   : (C_out_l, 1)
    out   : (C_last, tile_R)
    """
    out_ref = refs[-1]
    wb = refs[:-1]
    num_layers = len(wb) // 2

    # Layer 1: one MXU pass, K = 4*C_in, lane-dense M.
    act = jnp.dot(wb[0][...], x_ref[...], preferred_element_type=jnp.float32)
    act = jnp.maximum(act + wb[1][...], 0.0)

    # Layers 2..L: thanks to the nested-parity lane order, each layer's four
    # 2x2 tap groups are the four contiguous lane quarters of the previous
    # activation -- no gathers, transposes or strided accesses.
    for l in range(1, num_layers):
        w_ref, b_ref = wb[2 * l], wb[2 * l + 1]
        mn = act.shape[1] // 4
        acc = jnp.dot(w_ref[0], act[:, :mn], preferred_element_type=jnp.float32)
        for t in range(1, 4):
            acc = acc + jnp.dot(w_ref[t], act[:, t * mn:(t + 1) * mn],
                                preferred_element_type=jnp.float32)
        act = jnp.maximum(acc + b_ref[...], 0.0)

    out_ref[...] = act.astype(out_ref.dtype)


def downsample_block(x, params):
    """params: list of (weight (C_out, C_in, 2, 2), bias (C_out,)) per layer."""
    n, c_in, h, w = x.shape
    num_layers = len(params)
    assert num_layers >= 1
    # TODO(synk): odd spatial dims (which PyTorch would floor-crop) are not
    # handled; H and W must be divisible by 2**num_layers.
    assert h % (1 << num_layers) == 0 and w % (1 << num_layers) == 0

    h_out, w_out = h >> num_layers, w >> num_layers
    p = 4 ** (num_layers - 1)
    r_total = n * h_out * w_out
    itemsize = jnp.dtype(x.dtype).itemsize

    tile_r = _pick_tile_r(r_total, p, c_in, itemsize)
    num_tiles = r_total // tile_r
    m_t = p * tile_r                              # layer-1 lane width per tile

    x0 = _prepare_input(x, num_layers, tile_r)    # (4*c_in, num_tiles * m_t)

    operands = [x0]
    in_specs = [pl.BlockSpec((4 * c_in, m_t), lambda r: (0, r))]

    flops = 0
    bytes_accessed = int(x0.size) * itemsize
    c_prev = c_in
    m_layer = p * r_total                         # layer-1 pixels, all batches
    for l, (wgt, bias) in enumerate(params):
        c_out = int(wgt.shape[0])
        if l == 0:
            # (C_out, C_in, 2, 2) -> (C_out, kh, kw, C_in) -> (C_out, 4*C_in)
            w_m = jnp.transpose(wgt, (0, 2, 3, 1)).reshape(c_out, 4 * c_prev)
            in_specs.append(pl.BlockSpec((c_out, 4 * c_prev), lambda r: (0, 0)))
        else:
            # per-tap matrices W_t[co, ci] = w[co, ci, kh, kw], t = kh*2 + kw
            w_m = jnp.transpose(wgt, (2, 3, 0, 1)).reshape(4, c_out, c_prev)
            in_specs.append(
                pl.BlockSpec((4, c_out, c_prev), lambda r: (0, 0, 0)))
        b_m = bias.reshape(c_out, 1)
        operands += [w_m, b_m]
        in_specs.append(pl.BlockSpec((c_out, 1), lambda r: (0, 0)))
        flops += 2 * m_layer * (4 * c_prev) * c_out
        bytes_accessed += (int(w_m.size) + int(b_m.size)) * itemsize
        c_prev = c_out
        m_layer //= 4

    c_last = c_prev
    bytes_accessed += c_last * r_total * itemsize

    out_shape = jax.ShapeDtypeStruct((c_last, r_total), x.dtype)
    out_spec = pl.BlockSpec((c_last, tile_r), lambda r: (0, r))

    # VMEM budget with (8,128) tile padding: double-buffered input/output
    # blocks, resident weights/biases (conservatively counted twice), and the
    # live intermediate activations of every layer.
    vmem = 2 * _padded_bytes((4 * c_in, m_t), itemsize)
    vmem += 2 * _padded_bytes((c_last, tile_r), itemsize)
    for op in operands[1:]:
        vmem += 2 * _padded_bytes(op.shape, itemsize)
    m_l = m_t
    for wgt, _ in params:
        vmem += 2 * _padded_bytes((int(wgt.shape[0]), m_l), itemsize)
        m_l //= 4
    vmem_limit = int(min(32 << 20, max(16 << 20, 2 * vmem)))

    out = pl.pallas_call(
        _fused_downsample_kernel,
        out_shape=out_shape,
        grid_spec=pltpu.PrefetchScalarGridSpec(
            num_scalar_prefetch=0,
            grid=(num_tiles,),
            in_specs=in_specs,
            out_specs=out_spec,
        ),
        compiler_params=pltpu.CompilerParams(
            dimension_semantics=("parallel",),
            vmem_limit_bytes=vmem_limit,
        ),
        cost_estimate=pl.CostEstimate(
            flops=int(flops),
            transcendentals=0,
            bytes_accessed=int(bytes_accessed),
        ),
    )(*operands)

    # (C_last, n*h_out*w_out) -> NCHW (tiny output-side transpose).
    return jnp.transpose(out.reshape(c_last, n, h_out, w_out), (1, 0, 2, 3))


def init_params(key, in_channels, channels):
    params = []
    last = in_channels
    for ch in channels:
        key, kw, kb = jax.random.split(key, 3)
        fan_in = last * 2 * 2
        bound = 1.0 / jnp.sqrt(fan_in)
        w = jax.random.uniform(kw, (ch, last, 2, 2), jnp.float32, -bound, bound)
        b = jax.random.uniform(kb, (ch,), jnp.float32, -bound, bound)
        params.append((w, b))
        last = ch
    return params


def _reference(x, params):
    # Pure-JAX reference using lax.conv_general_dilated (NCHW / OIHW).
    out = x
    for w, b in params:
        out = jax.lax.conv_general_dilated(
            out, w, window_strides=(2, 2), padding="VALID",
            dimension_numbers=("NCHW", "OIHW", "NCHW"))
        out = jnp.maximum(out + b[None, :, None, None], 0.0)
    return out


if __name__ == "__main__":
    key = jax.random.PRNGKey(0)
    key, kx = jax.random.split(key)

    in_channels = 4
    channels = (8, 16)          # two downsample stages: 16x16 -> 8x8 -> 4x4
    x = jax.random.normal(kx, (2, in_channels, 16, 16), jnp.float32)
    params = init_params(key, in_channels, channels)

    out = jax.block_until_ready(downsample_block(x, params))
    ref = _reference(x, params)
    assert out.shape == (2, channels[-1], 4, 4), out.shape
    assert jnp.allclose(out, ref, atol=1e-4, rtol=1e-4), float(
        jnp.max(jnp.abs(out - ref)))

    # Larger shape exercising the spatial-tiling (multi grid step) path.
    key, kx2, kp2 = jax.random.split(key, 3)
    x2 = jax.random.normal(kx2, (2, 3, 128, 128), jnp.float32)
    params2 = init_params(kp2, 3, (8, 16))
    out2 = jax.block_until_ready(downsample_block(x2, params2))
    ref2 = _reference(x2, params2)
    assert out2.shape == (2, 16, 32, 32), out2.shape
    assert jnp.allclose(out2, ref2, atol=1e-4, rtol=1e-4), float(
        jnp.max(jnp.abs(out2 - ref2)))

    print("KERNEL_OK")
</pallas_src>

<mosaic_0001>
module attributes {stable_mosaic.version = 11 : i64} {
  func.func @_fused_downsample_kernel(%arg0: i32, %arg1: memref<16x128xf32, #tpu.memory_space<vmem>>, %arg2: memref<8x16xf32, #tpu.memory_space<vmem>>, %arg3: memref<8x1xf32, #tpu.memory_space<vmem>>, %arg4: memref<4x16x8xf32, #tpu.memory_space<vmem>>, %arg5: memref<16x1xf32, #tpu.memory_space<vmem>>, %arg6: memref<16x32xf32, #tpu.memory_space<vmem>>) attributes {dimension_semantics = [#tpu.dimension_semantics<parallel>], iteration_bounds = array<i64: 1>, scalar_prefetch = 0 : i64, scratch_operands = 0 : i64, tpu.core_type = #tpu.core_type<tc>, window_params = [{transform_indices = @transform_0, window_bounds = array<i64: 16, 128>}, {pipeline_mode = #tpu.pipeline_mode<synchronous>, transform_indices = @transform_1, window_bounds = array<i64: 8, 16>}, {pipeline_mode = #tpu.pipeline_mode<synchronous>, transform_indices = @transform_2, window_bounds = array<i64: 8, 1>}, {pipeline_mode = #tpu.pipeline_mode<synchronous>, transform_indices = @transform_3, window_bounds = array<i64: 4, 16, 8>}, {pipeline_mode = #tpu.pipeline_mode<synchronous>, transform_indices = @transform_4, window_bounds = array<i64: 16, 1>}, {transform_indices = @transform_5, window_bounds = array<i64: 16, 32>}]} {
    %c0 = arith.constant 0 : index
    %c0_0 = arith.constant 0 : index
    %0 = vector.load %arg2[%c0, %c0_0] : memref<8x16xf32, #tpu.memory_space<vmem>>, vector<8x16xf32>
    %c0_1 = arith.constant 0 : index
    %c0_2 = arith.constant 0 : index
    %1 = vector.load %arg1[%c0_1, %c0_2] : memref<16x128xf32, #tpu.memory_space<vmem>>, vector<16x128xf32>
    %cst = arith.constant dense<0.000000e+00> : vector<8x128xf32>
    %2 = tpu.matmul %0, %1, %cst {dimension_numbers = #tpu.dot_dimension_numbers<[1], [0], [0], [1], [0, 0, 1, 1], [], []>} : vector<8x16xf32>, vector<16x128xf32>, vector<8x128xf32> -> vector<8x128xf32>
    %c0_3 = arith.constant 0 : index
    %c0_4 = arith.constant 0 : index
    %3 = vector.load %arg3[%c0_3, %c0_4] : memref<8x1xf32, #tpu.memory_space<vmem>>, vector<8x1xf32>
    %4 = vector.broadcast %3 : vector<8x1xf32> to vector<8x128xf32>
    %5 = arith.addf %2, %4 : vector<8x128xf32>
    %cst_5 = arith.constant 0.000000e+00 : f32
    %6 = vector.broadcast %cst_5 : f32 to vector<8x128xf32>
    %7 = arith.maximumf %5, %6 : vector<8x128xf32>
    %c0_6 = arith.constant 0 : index
    %c0_7 = arith.constant 0 : index
    %c0_8 = arith.constant 0 : index
    %8 = vector.load %arg4[%c0_6, %c0_7, %c0_8] : memref<4x16x8xf32, #tpu.memory_space<vmem>>, vector<1x16x8xf32>
    %9 = vector.shape_cast %8 : vector<1x16x8xf32> to vector<16x8xf32>
    %10 = vector.extract_strided_slice %7 {offsets = [0, 0], sizes = [8, 32], strides = [1, 1]} : vector<8x128xf32> to vector<8x32xf32>
    %cst_9 = arith.constant dense<0.000000e+00> : vector<16x32xf32>
    %11 = tpu.matmul %9, %10, %cst_9 {dimension_numbers = #tpu.dot_dimension_numbers<[1], [0], [0], [1], [0, 0, 1, 1], [], []>} : vector<16x8xf32>, vector<8x32xf32>, vector<16x32xf32> -> vector<16x32xf32>
    %c1 = arith.constant 1 : index
    %c0_10 = arith.constant 0 : index
    %c0_11 = arith.constant 0 : index
    %12 = vector.load %arg4[%c1, %c0_10, %c0_11] : memref<4x16x8xf32, #tpu.memory_space<vmem>>, vector<1x16x8xf32>
    %13 = vector.shape_cast %12 : vector<1x16x8xf32> to vector<16x8xf32>
    %14 = vector.extract_strided_slice %7 {offsets = [0, 32], sizes = [8, 32], strides = [1, 1]} : vector<8x128xf32> to vector<8x32xf32>
    %cst_12 = arith.constant dense<0.000000e+00> : vector<16x32xf32>
    %15 = tpu.matmul %13, %14, %cst_12 {dimension_numbers = #tpu.dot_dimension_numbers<[1], [0], [0], [1], [0, 0, 1, 1], [], []>} : vector<16x8xf32>, vector<8x32xf32>, vector<16x32xf32> -> vector<16x32xf32>
    %16 = arith.addf %11, %15 : vector<16x32xf32>
    %c2 = arith.constant 2 : index
    %c0_13 = arith.constant 0 : index
    %c0_14 = arith.constant 0 : index
    %17 = vector.load %arg4[%c2, %c0_13, %c0_14] : memref<4x16x8xf32, #tpu.memory_space<vmem>>, vector<1x16x8xf32>
    %18 = vector.shape_cast %17 : vector<1x16x8xf32> to vector<16x8xf32>
    %19 = vector.extract_strided_slice %7 {offsets = [0, 64], sizes = [8, 32], strides = [1, 1]} : vector<8x128xf32> to vector<8x32xf32>
    %cst_15 = arith.constant dense<0.000000e+00> : vector<16x32xf32>
    %20 = tpu.matmul %18, %19, %cst_15 {dimension_numbers = #tpu.dot_dimension_numbers<[1], [0], [0], [1], [0, 0, 1, 1], [], []>} : vector<16x8xf32>, vector<8x32xf32>, vector<16x32xf32> -> vector<16x32xf32>
    %21 = arith.addf %16, %20 : vector<16x32xf32>
    %c3 = arith.constant 3 : index
    %c0_16 = arith.constant 0 : index
    %c0_17 = arith.constant 0 : index
    %22 = vector.load %arg4[%c3, %c0_16, %c0_17] : memref<4x16x8xf32, #tpu.memory_space<vmem>>, vector<1x16x8xf32>
    %23 = vector.shape_cast %22 : vector<1x16x8xf32> to vector<16x8xf32>
    %24 = vector.extract_strided_slice %7 {offsets = [0, 96], sizes = [8, 32], strides = [1, 1]} : vector<8x128xf32> to vector<8x32xf32>
    %cst_18 = arith.constant dense<0.000000e+00> : vector<16x32xf32>
    %25 = tpu.matmul %23, %24, %cst_18 {dimension_numbers = #tpu.dot_dimension_numbers<[1], [0], [0], [1], [0, 0, 1, 1], [], []>} : vector<16x8xf32>, vector<8x32xf32>, vector<16x32xf32> -> vector<16x32xf32>
    %26 = arith.addf %21, %25 : vector<16x32xf32>
    %c0_19 = arith.constant 0 : index
    %c0_20 = arith.constant 0 : index
    %27 = vector.load %arg5[%c0_19, %c0_20] : memref<16x1xf32, #tpu.memory_space<vmem>>, vector<16x1xf32>
    %28 = vector.broadcast %27 : vector<16x1xf32> to vector<16x32xf32>
    %29 = arith.addf %26, %28 : vector<16x32xf32>
    %cst_21 = arith.constant 0.000000e+00 : f32
    %30 = vector.broadcast %cst_21 : f32 to vector<16x32xf32>
    %31 = arith.maximumf %29, %30 : vector<16x32xf32>
    %c0_22 = arith.constant 0 : index
    %c0_23 = arith.constant 0 : index
    %32 = vector.load %arg6[%c0_22, %c0_23] : memref<16x32xf32, #tpu.memory_space<vmem>>, vector<16x32xf32>
    tpu.vector_store %arg6[%c0_22, %c0_23], %31 {strides = array<i32>} : memref<16x32xf32, #tpu.memory_space<vmem>>, vector<16x32xf32>,
    return
  }
  func.func @transform_0(%arg0: i32) -> (i32, i32) {
    %c0_i32 = arith.constant 0 : i32
    %c0_i32_0 = arith.constant 0 : i32
    return %c0_i32, %arg0 : i32, i32
  }
  func.func @transform_1(%arg0: i32) -> (i32, i32) {
    %c0_i32 = arith.constant 0 : i32
    %c0_i32_0 = arith.constant 0 : i32
    %c0_i32_1 = arith.constant 0 : i32
    return %c0_i32, %c0_i32_0 : i32, i32
  }
  func.func @transform_2(%arg0: i32) -> (i32, i32) {
    %c0_i32 = arith.constant 0 : i32
    %c0_i32_0 = arith.constant 0 : i32
    %c0_i32_1 = arith.constant 0 : i32
    return %c0_i32, %c0_i32_0 : i32, i32
  }
  func.func @transform_3(%arg0: i32) -> (i32, i32, i32) {
    %c0_i32 = arith.constant 0 : i32
    %c0_i32_0 = arith.constant 0 : i32
    %c0_i32_1 = arith.constant 0 : i32
    %c0_i32_2 = arith.constant 0 : i32
    return %c0_i32, %c0_i32_0, %c0_i32_1 : i32, i32, i32
  }
  func.func @transform_4(%arg0: i32) -> (i32, i32) {
    %c0_i32 = arith.constant 0 : i32
    %c0_i32_0 = arith.constant 0 : i32
    %c0_i32_1 = arith.constant 0 : i32
    return %c0_i32, %c0_i32_0 : i32, i32
  }
  func.func @transform_5(%arg0: i32) -> (i32, i32) {
    %c0_i32 = arith.constant 0 : i32
    %c0_i32_0 = arith.constant 0 : i32
    return %c0_i32, %arg0 : i32, i32
  }
}

</mosaic_0001>

<bundles_post_ra>
// kernel: tpu_custom_call.1
= control target key start
LH: loop header
LB: loop body
LE: loop exit
PB: predicated region body
PF: predicated region fallthrough
CT: control target
= control target key end

     0   :  { %v592_v2 = vmov 0.0|0.0   ;;  %vm593_vm0 = vmmov 0   ;;  %v594_v4 = vmov 0.0   ;;  %s694_s0 = inlined_call_operand.vmem [shape: f32[16,128], index: 0, kind: input, shape index: {}]   ;;  %s695_s1 = inlined_call_operand.vmem [shape: f32[8,16], index: 1, kind: input, shape index: {}]   ;;  %s696_s2 = inlined_call_operand.vmem [shape: f32[8,1], index: 2, kind: input, shape index: {}]   ;;  %s697_s3 = inlined_call_operand.vmem [shape: f32[4,16,8], index: 3, kind: input, shape index: {}]   ;;  %s698_s4 = inlined_call_operand.vmem [shape: f32[16,1], index: 4, kind: input, shape index: {}]   ;;  %s699_s5 = inlined_call_operand.hbm [shape: f32[16,32], index: 5, kind: output, shape index: {}]  }
   0x1   :  { %v22_v0 = vld [vmem:[%s694_s0] sm:$0xff]  ;;  %v23_v1 = vld [vmem:[%s694_s0 + $0x8] sm:$0xff]  ;;  %547 = vmatprep.subr.bf16.mxu0 %v592_v2  ;;  %524 = vmatprep.mubr.msk.f32.mxu0 %vm593_vm0, %v594_v4 }
   0x2   :  { %v548_v3 = vpack.c.bf16 %v23_v1, %v22_v0  ;;  %v24_v5 = vld [vmem:[%s696_s2] sm:$0xff] }
   0x3   :  { %10 = vsyncpa [#allocation3], 0  ;;  %v595_v6 = vmov 0   ;;  %v21_v7 = vld [vmem:[%s695_s1] sm:$0xff]  ;;  %vm30_vm1 = vcmask 130048   ;;  %vm114_vm2 = vcmask 64512  }
   0x4   :  { %566 = vset.pattern.permute.xlu0 %v595_v6  ;;  %567 = vset.pattern.permute.xlu1 %v595_v6  ;;  %v105_v8 = vld [vmem:[%s697_s3] sm:$0xff]  ;;  %v491_v9 = vld [vmem:[%s697_s3 + $0x10] sm:$0xff]  ;;  %s596_s1 = smov 96   ;;  %s597_s28 = smov 64   ;;  %v106_v15 = vld [vmem:[%s697_s3 + $0x8] sm:$0xff]  ;;  %vm471_vm3 = vcmask 261120  }
   0x5   :  { %549 = vmatpush3.bf16.msra.mxu0 %v548_v3  ;;  %27 = vperm.xlu0 %566, %v24_v5   ;;  %v455_v16 = vld [vmem:[%s698_s4] sm:$0xff]  ;;  %s598_s10 = smov 32   ;;  %v456_v18 = vld [vmem:[%s698_s4 + $0x8] sm:$0xff]  ;;  %v492_v22 = vld [vmem:[%s697_s3 + $0x18] sm:$0xff]  ;;  %s599_s20 = smov [#allocation2]  }
   0x6   :  { %534 = vmatprep.mubr.msk.f32.mxu1 %vm114_vm2, %v105_v8  ;;  %v497_v17 = vld [vmem:[%s697_s3 + $0x20] sm:$0xff]  ;;  %v498_v21 = vld [vmem:[%s697_s3 + $0x28] sm:$0xff]  ;;  %v501_v23 = vld [vmem:[%s697_s3 + $0x30] sm:$0xff]  ;;  %s479_s21 = sshll.u32 %s599_s20, 4  ;;  %s480_s21 = int_to_ptr.vmem [resolvable:$true] %s479_s21 }
   0x7   :  { %v502_v25 = vld [vmem:[%s697_s3 + $0x38] sm:$0xff]  ;;  %s568_s3 = scalar_lea.vmem %s480_s21, 256  ;;  %p573_p1 = scmp.lt.s32.totalorder %s480_s21, %s480_s21 }
   0x8   :  { %525 = vmatmul.mubr.msk.f32.vlgmr.msra.gmra.mrb[0].mxu0 %vm30_vm1, %v21_v7  ;;  %p569_p0 = scmp.ne.s32.totalorder %s480_s21, %s568_s3  ;;  %p574_p2 = scmp.lt.s32.totalorder %s568_s3, %s568_s3 }
   0x9   :  { %529 = vmatprep.mubr.msk.f32.mxu0 %vm114_vm2, %v491_v9 }
   0xa   :  { %p575_p3 = por %p574_p2, %p573_p1 }
   0xc   :  { %p576_p4 = pnand %p575_p3, %p569_p0 }
  0x84   :  { %v28_v10 = vpop.permute.xlu0 %27 }
  0xdb   :  { %v100_v11 = vpop.f32.mrb[0].mxu0 }
  0xdc   :  { %v101_v12 = vadd.f32 %v100_v11, %v28_v10  ;;  %v526_v13 = vpop.f32.mrb[1].mxu0 }
  0xde   :  { %v104_v14 = vmax.f32 %v101_v12, 0.0 }
  0xe0   :  { %111 = vrot.lane.b32.xlu1 %v104_v14, %s596_s1  ;;  %280 = vrot.lane.b32.xlu0 %v104_v14, %s597_s28 }
  0xe1   :  { %532 = vmatprep.subr.mxu1 %v104_v14 }
  0xe2   :  { %533 = vmatpush3.msra.mxu1 %v104_v14 }
  0xe3   :  { %535 = vmatmul.mubr.msk.f32.vlgmr.msra.gmra.mrb[0].mxu1 %vm114_vm2, %v106_v15 }
  0xe4   :  { %369 = vrot.lane.b32.xlu1 %v104_v14, %s598_s10  ;;  %459 = vperm.xlu0 %566, %v455_v16  }
  0xe5   :  { %539 = vmatprep.mubr.msk.f32.mxu1 %vm114_vm2, %v497_v17 }
  0xe8   :  { %464 = vperm.xlu1 %567, %v456_v18  }
 0x152   :  { %v112_v19 = vpop.permute.xlu1 %111  ;;  %v281_v20 = vpop.permute.xlu0 %280 }
 0x153   :  { %527 = vmatprep.subr.mxu0 %v112_v19  ;;  %537 = vmatprep.subr.mxu1 %v281_v20 }
 0x154   :  { %528 = vmatpush3.msra.mxu0 %v112_v19  ;;  %538 = vmatpush3.msra.mxu1 %v281_v20 }
 0x155   :  { %540 = vmatmul.mubr.msk.f32.vlgmr.msra.gmra.mrb[0].mxu1 %vm114_vm2, %v498_v21  ;;  %530 = vmatmul.mubr.msk.f32.vlgmr.msra.gmra.mrb[2].mxu0 %vm114_vm2, %v492_v22 }
 0x156   :  { %v370_v24 = vpop.permute.xlu1 %369  ;;  %544 = vmatprep.mubr.msk.f32.mxu1 %vm114_vm2, %v501_v23 }
 0x157   :  { %542 = vmatprep.subr.mxu1 %v370_v24 }
 0x158   :  { %543 = vmatpush3.msra.mxu1 %v370_v24 }
 0x15d   :  { %545 = vmatmul.mubr.msk.f32.vlgmr.msra.gmra.mrb[0].mxu1 %vm114_vm2, %v502_v25 }
 0x163   :  { %v460_v33 = vpop.permute.xlu0 %459 }
 0x167   :  { %v465_v29 = vpop.permute.xlu1 %464 }
 0x228   :  { %v531_v26 = vpop.f32.mrb[2].mxu0 }
 0x229   :  { %v187_v27 = vpop.f32.mrb[3].mxu0 }
 0x230   :  { %v546_v28 = vpop.f32.mrb[0].mxu1 }
 0x231   :  { %v550_v30 = vadd.f32 %v546_v28, %v531_v26  ;;  %v444_v31 = vpop.f32.mrb[1].mxu1 }
 0x232   :  { %v551_v32 = vadd.f32 %v444_v31, %v187_v27 }
 0x233   :  { %v468_v34 = vadd.f32 %v550_v30, %v465_v29 }
 0x234   :  { %v467_v35 = vadd.f32 %v551_v32, %v460_v33 }
 0x235   :  { %v470_v36 = vmax.f32 %v468_v34, 0.0 }
 0x236   :  { %v469_v37 = vmax.f32 %v467_v35, 0.0 }
 0x237   :  { %473 = vst.msk [vmem:[#allocation2 + $0x8] sm:$0xff] %vm471_vm3, %v470_v36 }
 0x238   :  { %472 = vst.msk [vmem:[#allocation2] sm:$0xff] %vm471_vm3, %v469_v37 }
 0x239   :  { %579 = shalt.err (!%p576_p4)
}
 0x23a   :  { %s580_s24 = scalar_lea.hbm %s699_s5, 256 }
 0x23b   :  { %p581_p5 = scmp.ne.s32.totalorder %s699_s5, %s580_s24  ;;  %p584_p6 = scmp.lt.u32.totalorder %s580_s24, %s699_s5 }
 0x23d   :  { %p586_p7 = pnand %p584_p6, %p581_p5 }
 0x23f   :  { %589 = shalt.err (!%p586_p7)
}
 0x240   :  { %s600_s27 = smov 128   ;;  %s601_s1 = smov 8  }
 0x241   :  { %485 = dma.vmem_to_hbm [thread:$0]  %s480_s21, 256, %s699_s5, [#allocation3], %s600_s27, %s600_s27, %s601_s1  }
 0x242   :  { %590 = dma.done.wait [#allocation3], 256  }
 0x243   :  { %591 = vsyncadd [#allocation3], 4294967040 }
 0x244   :  { %489 = vsyncpa [#allocation3], 1 }

</bundles_post_ra>
